<compile_context>
chip_gen: v6e
topology: v6e:2x2x1
jax: 0.10.0
libtpu: 0.0.40
codegen_flags: <defaults>
</compile_context>

<pallas_src>
import math
import jax
import jax.numpy as jnp
from jax.experimental import pallas as pl
from jax.experimental.pallas import tpu as pltpu

# ---- small, module-consistent sizes ----
B = 2          # batch
S = 8          # sequence length
D = 32         # d_model ("size")
H = 4          # n_heads
DK = D // H    # per-head dim
DFF = 64       # d_feedforward
EPS = 1e-5     # nn.LayerNorm default eps
NEG = -1e9     # masked_fill value


def decoder_layer_kernel(x_ref, addm_ref,
                         wqkv_ref, bqkv_ref, wo_ref, bo_ref,
                         g1_ref, be1_ref,
                         w1_ref, b1_ref, w2_ref, b2_ref,
                         g2_ref, be2_ref,
                         o_ref):
    x = x_ref[...]                                              # (B*S, D)

    # ---- fused QKV projection: one (B*S, D) x (D, 3D) MXU matmul ----
    qkv = jnp.dot(x, wqkv_ref[...],
                  preferred_element_type=jnp.float32) + bqkv_ref[...]   # (B*S, 3D)

    addm = addm_ref[...]                                        # (S, S) additive mask
    scale = 1.0 / math.sqrt(DK)

    # ---- attention: static loop over heads only, batched over B via 3-D einsums ----
    ctx_heads = []
    for h in range(H):
        qh = qkv[:, 0 * D + h * DK:0 * D + (h + 1) * DK].reshape(B, S, DK)
        kh = qkv[:, 1 * D + h * DK:1 * D + (h + 1) * DK].reshape(B, S, DK)
        vh = qkv[:, 2 * D + h * DK:2 * D + (h + 1) * DK].reshape(B, S, DK)
        s = jnp.einsum("bqd,bkd->bqk", qh, kh,
                       preferred_element_type=jnp.float32) * scale      # (B, S, S)
        s = s + addm[None, :, :]
        m = jnp.max(s, axis=-1, keepdims=True)
        e = jnp.exp(s - m)
        denom = jnp.sum(e, axis=-1, keepdims=True)
        p = e * pl.reciprocal(denom, approx=True)               # EUP slot
        ctx_heads.append(jnp.einsum("bqk,bkd->bqd", p, vh,
                                    preferred_element_type=jnp.float32))  # (B, S, DK)

    # One value-level combine (no VMEM scratch round trip, no masked partial stores).
    ctx = jnp.concatenate(ctx_heads, axis=-1).reshape(B * S, D)

    # ---- output projection ----
    attn = jnp.dot(ctx, wo_ref[...],
                   preferred_element_type=jnp.float32) + bo_ref[...]

    # ---- residual + LayerNorm1 (dropout1 is identity in eval) ----
    h1 = x + attn
    mu1 = jnp.mean(h1, axis=-1, keepdims=True)
    var1 = jnp.mean((h1 - mu1) ** 2, axis=-1, keepdims=True)
    h1 = (h1 - mu1) * jax.lax.rsqrt(var1 + EPS) * g1_ref[...] + be1_ref[...]

    # ---- position-wise feed-forward ----
    ff = jnp.dot(h1, w1_ref[...], preferred_element_type=jnp.float32) + b1_ref[...]
    ff = jnp.maximum(ff, 0.0)
    ff = jnp.dot(ff, w2_ref[...], preferred_element_type=jnp.float32) + b2_ref[...]

    # ---- residual + LayerNorm2 (dropout2 is identity in eval) ----
    h2 = h1 + ff
    mu2 = jnp.mean(h2, axis=-1, keepdims=True)
    var2 = jnp.mean((h2 - mu2) ** 2, axis=-1, keepdims=True)
    o_ref[...] = (h2 - mu2) * jax.lax.rsqrt(var2 + EPS) * g2_ref[...] + be2_ref[...]


def long_decoder_layer(x, mask, params):
    """x: (B, S, D) f32; mask: (S, S), nonzero = attend (shared across batch).

    params must already contain the fused QKV weight/bias (built at setup time).
    """
    # Additive mask (tiny (S,S) op, kept out of the kernel).
    addm = jnp.where(mask == 0, jnp.float32(NEG), jnp.float32(0.0))

    weights = [
        params["wqkv"], params["bqkv"], params["wo"], params["bo"],
        params["g1"], params["be1"],
        params["w1"], params["b1"], params["w2"], params["b2"],
        params["g2"], params["be2"],
    ]

    x2 = x.reshape(B * S, D)   # fold batch into the matmul M dimension

    in_specs = [
        pl.BlockSpec((B * S, D), lambda i: (0, 0)),
        pl.BlockSpec((S, S), lambda i: (0, 0)),
    ] + [pl.BlockSpec(w.shape, lambda i: (0, 0)) for w in weights]

    # Advisory cost estimate so XLA schedules surrounding ops sensibly.
    flops = (2 * (B * S) * D * (3 * D)          # QKV proj
             + 4 * B * H * S * S * DK           # scores + p@v
             + 2 * (B * S) * D * D              # out proj
             + 4 * (B * S) * D * DFF)           # FFN (two matmuls)
    transcendentals = B * H * S * S + 2 * (B * S)
    bytes_accessed = 4 * (int(x2.size) + int(addm.size)
                          + sum(int(w.size) for w in weights) + B * S * D)

    out = pl.pallas_call(
        decoder_layer_kernel,
        out_shape=jax.ShapeDtypeStruct((B * S, D), jnp.float32),
        grid_spec=pltpu.PrefetchScalarGridSpec(
            num_scalar_prefetch=0,
            grid=(1,),                       # single step: no per-step pipeline overhead
            in_specs=in_specs,
            out_specs=pl.BlockSpec((B * S, D), lambda i: (0, 0)),
        ),
        compiler_params=pltpu.CompilerParams(
            dimension_semantics=("arbitrary",)),
        cost_estimate=pl.CostEstimate(flops=flops,
                                      transcendentals=transcendentals,
                                      bytes_accessed=bytes_accessed),
    )(x2, addm, *weights)
    return out.reshape(B, S, D)


# ---------------- pure-JAX reference (for verification) ----------------
def reference(x, mask, p):
    q = x @ p["wq"] + p["bq"][0]
    k = x @ p["wk"] + p["bk"][0]
    v = x @ p["wv"] + p["bv"][0]
    qh = q.reshape(B, S, H, DK).transpose(0, 2, 1, 3)
    kh = k.reshape(B, S, H, DK).transpose(0, 2, 1, 3)
    vh = v.reshape(B, S, H, DK).transpose(0, 2, 1, 3)
    scores = jnp.einsum("bhqd,bhkd->bhqk", qh, kh) / math.sqrt(DK)
    scores = jnp.where(mask[None, None, :, :] == 0, NEG, scores)
    pattn = jax.nn.softmax(scores, axis=-1)
    a = jnp.einsum("bhqk,bhkd->bhqd", pattn, vh)
    a = a.transpose(0, 2, 1, 3).reshape(B, S, D)
    attn = a @ p["wo"] + p["bo"][0]

    def ln(y, g, be):
        mu = jnp.mean(y, axis=-1, keepdims=True)
        var = jnp.mean((y - mu) ** 2, axis=-1, keepdims=True)
        return (y - mu) / jnp.sqrt(var + EPS) * g[0] + be[0]

    h1 = ln(x + attn, p["g1"], p["be1"])
    ff = jnp.maximum(h1 @ p["w1"] + p["b1"][0], 0.0) @ p["w2"] + p["b2"][0]
    return ln(h1 + ff, p["g2"], p["be2"])


if __name__ == "__main__":
    key = jax.random.PRNGKey(0)
    ks = jax.random.split(key, 16)

    def lin(kk, fan_in, fan_out):
        # deterministic, roughly PyTorch-Linear-scaled init
        bound = 1.0 / math.sqrt(fan_in)
        w = jax.random.uniform(kk, (fan_in, fan_out), jnp.float32, -bound, bound)
        b = jax.random.uniform(jax.random.fold_in(kk, 1), (1, fan_out),
                               jnp.float32, -bound, bound)
        return w, b

    wq, bq = lin(ks[0], D, D)
    wk, bk = lin(ks[1], D, D)
    wv, bv = lin(ks[2], D, D)
    wo, bo = lin(ks[3], D, D)
    w1, b1 = lin(ks[4], D, DFF)
    w2, b2 = lin(ks[5], DFF, D)
    params = dict(
        wq=wq, bq=bq, wk=wk, bk=bk, wv=wv, bv=bv, wo=wo, bo=bo,
        w1=w1, b1=b1, w2=w2, b2=b2,
        g1=jnp.ones((1, D), jnp.float32), be1=jnp.zeros((1, D), jnp.float32),
        g2=jnp.ones((1, D), jnp.float32), be2=jnp.zeros((1, D), jnp.float32),
    )
    # Fuse QKV once at parameter-setup time (hoisted out of the per-call path).
    params["wqkv"] = jnp.concatenate([wq, wk, wv], axis=1)   # (D, 3D)
    params["bqkv"] = jnp.concatenate([bq, bk, bv], axis=1)   # (1, 3D)

    x = jax.random.normal(ks[6], (B, S, D), jnp.float32)
    # causal ("subsequent") mask, shared across the batch
    mask = jnp.tril(jnp.ones((S, S), jnp.float32))

    out = long_decoder_layer(x, mask, params)
    out = jax.block_until_ready(out)

    ref = reference(x, mask, params)
    assert out.shape == (B, S, D)
    # Tolerance accounts for the EUP approx-reciprocal softmax denominator.
    assert jnp.allclose(out, ref, atol=5e-3, rtol=5e-3), (
        float(jnp.max(jnp.abs(out - ref))))

    print("KERNEL_OK")
</pallas_src>

<mosaic_0001>
module attributes {stable_mosaic.version = 11 : i64} {
  func.func @decoder_layer_kernel(%arg0: i32, %arg1: memref<16x32xf32, #tpu.memory_space<vmem>>, %arg2: memref<8x8xf32, #tpu.memory_space<vmem>>, %arg3: memref<32x96xf32, #tpu.memory_space<vmem>>, %arg4: memref<1x96xf32, #tpu.memory_space<vmem>>, %arg5: memref<32x32xf32, #tpu.memory_space<vmem>>, %arg6: memref<1x32xf32, #tpu.memory_space<vmem>>, %arg7: memref<1x32xf32, #tpu.memory_space<vmem>>, %arg8: memref<1x32xf32, #tpu.memory_space<vmem>>, %arg9: memref<32x64xf32, #tpu.memory_space<vmem>>, %arg10: memref<1x64xf32, #tpu.memory_space<vmem>>, %arg11: memref<64x32xf32, #tpu.memory_space<vmem>>, %arg12: memref<1x32xf32, #tpu.memory_space<vmem>>, %arg13: memref<1x32xf32, #tpu.memory_space<vmem>>, %arg14: memref<1x32xf32, #tpu.memory_space<vmem>>, %arg15: memref<16x32xf32, #tpu.memory_space<vmem>>) attributes {dimension_semantics = [#tpu.dimension_semantics<arbitrary>], iteration_bounds = array<i64: 1>, scalar_prefetch = 0 : i64, scratch_operands = 0 : i64, tpu.core_type = #tpu.core_type<tc>, window_params = [{pipeline_mode = #tpu.pipeline_mode<synchronous>, transform_indices = @transform_0, window_bounds = array<i64: 16, 32>}, {pipeline_mode = #tpu.pipeline_mode<synchronous>, transform_indices = @transform_1, window_bounds = array<i64: 8, 8>}, {pipeline_mode = #tpu.pipeline_mode<synchronous>, transform_indices = @transform_2, window_bounds = array<i64: 32, 96>}, {pipeline_mode = #tpu.pipeline_mode<synchronous>, transform_indices = @transform_3, window_bounds = array<i64: 1, 96>}, {pipeline_mode = #tpu.pipeline_mode<synchronous>, transform_indices = @transform_4, window_bounds = array<i64: 32, 32>}, {pipeline_mode = #tpu.pipeline_mode<synchronous>, transform_indices = @transform_5, window_bounds = array<i64: 1, 32>}, {pipeline_mode = #tpu.pipeline_mode<synchronous>, transform_indices = @transform_6, window_bounds = array<i64: 1, 32>}, {pipeline_mode = #tpu.pipeline_mode<synchronous>, transform_indices = @transform_7, window_bounds = array<i64: 1, 32>}, {pipeline_mode = #tpu.pipeline_mode<synchronous>, transform_indices = @transform_8, window_bounds = array<i64: 32, 64>}, {pipeline_mode = #tpu.pipeline_mode<synchronous>, transform_indices = @transform_9, window_bounds = array<i64: 1, 64>}, {pipeline_mode = #tpu.pipeline_mode<synchronous>, transform_indices = @transform_10, window_bounds = array<i64: 64, 32>}, {pipeline_mode = #tpu.pipeline_mode<synchronous>, transform_indices = @transform_11, window_bounds = array<i64: 1, 32>}, {pipeline_mode = #tpu.pipeline_mode<synchronous>, transform_indices = @transform_12, window_bounds = array<i64: 1, 32>}, {pipeline_mode = #tpu.pipeline_mode<synchronous>, transform_indices = @transform_13, window_bounds = array<i64: 1, 32>}, {pipeline_mode = #tpu.pipeline_mode<synchronous>, transform_indices = @transform_14, window_bounds = array<i64: 16, 32>}]} {
    %c0 = arith.constant 0 : index
    %c0_0 = arith.constant 0 : index
    %0 = vector.load %arg1[%c0, %c0_0] : memref<16x32xf32, #tpu.memory_space<vmem>>, vector<16x32xf32>
    %c0_1 = arith.constant 0 : index
    %c0_2 = arith.constant 0 : index
    %1 = vector.load %arg3[%c0_1, %c0_2] : memref<32x96xf32, #tpu.memory_space<vmem>>, vector<32x96xf32>
    %cst = arith.constant dense<0.000000e+00> : vector<16x96xf32>
    %2 = tpu.matmul %0, %1, %cst {dimension_numbers = #tpu.dot_dimension_numbers<[1], [0], [0], [1], [0, 0, 1, 1], [], []>} : vector<16x32xf32>, vector<32x96xf32>, vector<16x96xf32> -> vector<16x96xf32>
    %c0_3 = arith.constant 0 : index
    %c0_4 = arith.constant 0 : index
    %3 = vector.load %arg4[%c0_3, %c0_4] : memref<1x96xf32, #tpu.memory_space<vmem>>, vector<1x96xf32>
    %4 = vector.broadcast %3 : vector<1x96xf32> to vector<16x96xf32>
    %5 = arith.addf %2, %4 : vector<16x96xf32>
    %c0_5 = arith.constant 0 : index
    %c0_6 = arith.constant 0 : index
    %6 = vector.load %arg2[%c0_5, %c0_6] : memref<8x8xf32, #tpu.memory_space<vmem>>, vector<8x8xf32>
    %7 = vector.extract_strided_slice %5 {offsets = [0, 0], sizes = [16, 8], strides = [1, 1]} : vector<16x96xf32> to vector<16x8xf32>
    %8 = vector.shape_cast %7 : vector<16x8xf32> to vector<2x8x8xf32>
    %9 = vector.extract_strided_slice %5 {offsets = [0, 32], sizes = [16, 8], strides = [1, 1]} : vector<16x96xf32> to vector<16x8xf32>
    %10 = vector.shape_cast %9 : vector<16x8xf32> to vector<2x8x8xf32>
    %11 = vector.extract_strided_slice %5 {offsets = [0, 64], sizes = [16, 8], strides = [1, 1]} : vector<16x96xf32> to vector<16x8xf32>
    %12 = vector.shape_cast %11 : vector<16x8xf32> to vector<2x8x8xf32>
    "tpu.trace_start"() <{level = 10 : i32, message = "bqd,bkd->bqk"}> : () -> ()
    %cst_7 = arith.constant dense<0.000000e+00> : vector<2x8x8xf32>
    %13 = tpu.matmul %8, %10, %cst_7 {dimension_numbers = #tpu.dot_dimension_numbers<[2], [2], [1], [1], [0, 0, 0, 1, 1, 1], [0], [0]>} : vector<2x8x8xf32>, vector<2x8x8xf32>, vector<2x8x8xf32> -> vector<2x8x8xf32>
    "tpu.trace_stop"() : () -> ()
    %cst_8 = arith.constant 0.353553385 : f32
    %14 = vector.broadcast %cst_8 : f32 to vector<2x8x8xf32>
    %15 = arith.mulf %13, %14 : vector<2x8x8xf32>
    %16 = vector.shape_cast %6 : vector<8x8xf32> to vector<1x8x8xf32>
    %17 = vector.broadcast %16 : vector<1x8x8xf32> to vector<2x8x8xf32>
    %18 = arith.addf %15, %17 : vector<2x8x8xf32>
    %cst_9 = arith.constant dense<0xFF800000> : vector<2x8xf32>
    %19 = vector.multi_reduction <maximumf>, %18, %cst_9 [2] : vector<2x8x8xf32> to vector<2x8xf32>
    %20 = vector.shape_cast %19 : vector<2x8xf32> to vector<2x8x1xf32>
    %21 = vector.broadcast %20 : vector<2x8x1xf32> to vector<2x8x8xf32>
    %22 = arith.subf %18, %21 : vector<2x8x8xf32>
    %23 = math.exp %22 : vector<2x8x8xf32>
    %cst_10 = arith.constant dense<0.000000e+00> : vector<2x8xf32>
    %24 = vector.multi_reduction <add>, %23, %cst_10 [2] : vector<2x8x8xf32> to vector<2x8xf32>
    %25 = vector.shape_cast %24 : vector<2x8xf32> to vector<2x8x1xf32>
    %26 = tpu.reciprocal %25 {approx = true} : vector<2x8x1xf32> -> vector<2x8x1xf32>
    %27 = vector.broadcast %26 : vector<2x8x1xf32> to vector<2x8x8xf32>
    %28 = arith.mulf %23, %27 : vector<2x8x8xf32>
    "tpu.trace_start"() <{level = 10 : i32, message = "bqk,bkd->bqd"}> : () -> ()
    %cst_11 = arith.constant dense<0.000000e+00> : vector<2x8x8xf32>
    %29 = tpu.matmul %28, %12, %cst_11 {dimension_numbers = #tpu.dot_dimension_numbers<[2], [1], [1], [2], [0, 0, 0, 1, 1, 2], [0], [0]>} : vector<2x8x8xf32>, vector<2x8x8xf32>, vector<2x8x8xf32> -> vector<2x8x8xf32>
    "tpu.trace_stop"() : () -> ()
    %30 = vector.extract_strided_slice %5 {offsets = [0, 8], sizes = [16, 8], strides = [1, 1]} : vector<16x96xf32> to vector<16x8xf32>
    %31 = vector.shape_cast %30 : vector<16x8xf32> to vector<2x8x8xf32>
    %32 = vector.extract_strided_slice %5 {offsets = [0, 40], sizes = [16, 8], strides = [1, 1]} : vector<16x96xf32> to vector<16x8xf32>
    %33 = vector.shape_cast %32 : vector<16x8xf32> to vector<2x8x8xf32>
    %34 = vector.extract_strided_slice %5 {offsets = [0, 72], sizes = [16, 8], strides = [1, 1]} : vector<16x96xf32> to vector<16x8xf32>
    %35 = vector.shape_cast %34 : vector<16x8xf32> to vector<2x8x8xf32>
    "tpu.trace_start"() <{level = 10 : i32, message = "bqd,bkd->bqk"}> : () -> ()
    %cst_12 = arith.constant dense<0.000000e+00> : vector<2x8x8xf32>
    %36 = tpu.matmul %31, %33, %cst_12 {dimension_numbers = #tpu.dot_dimension_numbers<[2], [2], [1], [1], [0, 0, 0, 1, 1, 1], [0], [0]>} : vector<2x8x8xf32>, vector<2x8x8xf32>, vector<2x8x8xf32> -> vector<2x8x8xf32>
    "tpu.trace_stop"() : () -> ()
    %cst_13 = arith.constant 0.353553385 : f32
    %37 = vector.broadcast %cst_13 : f32 to vector<2x8x8xf32>
    %38 = arith.mulf %36, %37 : vector<2x8x8xf32>
    %39 = vector.shape_cast %6 : vector<8x8xf32> to vector<1x8x8xf32>
    %40 = vector.broadcast %39 : vector<1x8x8xf32> to vector<2x8x8xf32>
    %41 = arith.addf %38, %40 : vector<2x8x8xf32>
    %cst_14 = arith.constant dense<0xFF800000> : vector<2x8xf32>
    %42 = vector.multi_reduction <maximumf>, %41, %cst_14 [2] : vector<2x8x8xf32> to vector<2x8xf32>
    %43 = vector.shape_cast %42 : vector<2x8xf32> to vector<2x8x1xf32>
    %44 = vector.broadcast %43 : vector<2x8x1xf32> to vector<2x8x8xf32>
    %45 = arith.subf %41, %44 : vector<2x8x8xf32>
    %46 = math.exp %45 : vector<2x8x8xf32>
    %cst_15 = arith.constant dense<0.000000e+00> : vector<2x8xf32>
    %47 = vector.multi_reduction <add>, %46, %cst_15 [2] : vector<2x8x8xf32> to vector<2x8xf32>
    %48 = vector.shape_cast %47 : vector<2x8xf32> to vector<2x8x1xf32>
    %49 = tpu.reciprocal %48 {approx = true} : vector<2x8x1xf32> -> vector<2x8x1xf32>
    %50 = vector.broadcast %49 : vector<2x8x1xf32> to vector<2x8x8xf32>
    %51 = arith.mulf %46, %50 : vector<2x8x8xf32>
    "tpu.trace_start"() <{level = 10 : i32, message = "bqk,bkd->bqd"}> : () -> ()
    %cst_16 = arith.constant dense<0.000000e+00> : vector<2x8x8xf32>
    %52 = tpu.matmul %51, %35, %cst_16 {dimension_numbers = #tpu.dot_dimension_numbers<[2], [1], [1], [2], [0, 0, 0, 1, 1, 2], [0], [0]>} : vector<2x8x8xf32>, vector<2x8x8xf32>, vector<2x8x8xf32> -> vector<2x8x8xf32>
    "tpu.trace_stop"() : () -> ()
    %53 = vector.extract_strided_slice %5 {offsets = [0, 16], sizes = [16, 8], strides = [1, 1]} : vector<16x96xf32> to vector<16x8xf32>
    %54 = vector.shape_cast %53 : vector<16x8xf32> to vector<2x8x8xf32>
    %55 = vector.extract_strided_slice %5 {offsets = [0, 48], sizes = [16, 8], strides = [1, 1]} : vector<16x96xf32> to vector<16x8xf32>
    %56 = vector.shape_cast %55 : vector<16x8xf32> to vector<2x8x8xf32>
    %57 = vector.extract_strided_slice %5 {offsets = [0, 80], sizes = [16, 8], strides = [1, 1]} : vector<16x96xf32> to vector<16x8xf32>
    %58 = vector.shape_cast %57 : vector<16x8xf32> to vector<2x8x8xf32>
    "tpu.trace_start"() <{level = 10 : i32, message = "bqd,bkd->bqk"}> : () -> ()
    %cst_17 = arith.constant dense<0.000000e+00> : vector<2x8x8xf32>
    %59 = tpu.matmul %54, %56, %cst_17 {dimension_numbers = #tpu.dot_dimension_numbers<[2], [2], [1], [1], [0, 0, 0, 1, 1, 1], [0], [0]>} : vector<2x8x8xf32>, vector<2x8x8xf32>, vector<2x8x8xf32> -> vector<2x8x8xf32>
    "tpu.trace_stop"() : () -> ()
    %cst_18 = arith.constant 0.353553385 : f32
    %60 = vector.broadcast %cst_18 : f32 to vector<2x8x8xf32>
    %61 = arith.mulf %59, %60 : vector<2x8x8xf32>
    %62 = vector.shape_cast %6 : vector<8x8xf32> to vector<1x8x8xf32>
    %63 = vector.broadcast %62 : vector<1x8x8xf32> to vector<2x8x8xf32>
    %64 = arith.addf %61, %63 : vector<2x8x8xf32>
    %cst_19 = arith.constant dense<0xFF800000> : vector<2x8xf32>
    %65 = vector.multi_reduction <maximumf>, %64, %cst_19 [2] : vector<2x8x8xf32> to vector<2x8xf32>
    %66 = vector.shape_cast %65 : vector<2x8xf32> to vector<2x8x1xf32>
    %67 = vector.broadcast %66 : vector<2x8x1xf32> to vector<2x8x8xf32>
    %68 = arith.subf %64, %67 : vector<2x8x8xf32>
    %69 = math.exp %68 : vector<2x8x8xf32>
    %cst_20 = arith.constant dense<0.000000e+00> : vector<2x8xf32>
    %70 = vector.multi_reduction <add>, %69, %cst_20 [2] : vector<2x8x8xf32> to vector<2x8xf32>
    %71 = vector.shape_cast %70 : vector<2x8xf32> to vector<2x8x1xf32>
    %72 = tpu.reciprocal %71 {approx = true} : vector<2x8x1xf32> -> vector<2x8x1xf32>
    %73 = vector.broadcast %72 : vector<2x8x1xf32> to vector<2x8x8xf32>
    %74 = arith.mulf %69, %73 : vector<2x8x8xf32>
    "tpu.trace_start"() <{level = 10 : i32, message = "bqk,bkd->bqd"}> : () -> ()
    %cst_21 = arith.constant dense<0.000000e+00> : vector<2x8x8xf32>
    %75 = tpu.matmul %74, %58, %cst_21 {dimension_numbers = #tpu.dot_dimension_numbers<[2], [1], [1], [2], [0, 0, 0, 1, 1, 2], [0], [0]>} : vector<2x8x8xf32>, vector<2x8x8xf32>, vector<2x8x8xf32> -> vector<2x8x8xf32>
    "tpu.trace_stop"() : () -> ()
    %76 = vector.extract_strided_slice %5 {offsets = [0, 24], sizes = [16, 8], strides = [1, 1]} : vector<16x96xf32> to vector<16x8xf32>
    %77 = vector.shape_cast %76 : vector<16x8xf32> to vector<2x8x8xf32>
    %78 = vector.extract_strided_slice %5 {offsets = [0, 56], sizes = [16, 8], strides = [1, 1]} : vector<16x96xf32> to vector<16x8xf32>
    %79 = vector.shape_cast %78 : vector<16x8xf32> to vector<2x8x8xf32>
    %80 = vector.extract_strided_slice %5 {offsets = [0, 88], sizes = [16, 8], strides = [1, 1]} : vector<16x96xf32> to vector<16x8xf32>
    %81 = vector.shape_cast %80 : vector<16x8xf32> to vector<2x8x8xf32>
    "tpu.trace_start"() <{level = 10 : i32, message = "bqd,bkd->bqk"}> : () -> ()
    %cst_22 = arith.constant dense<0.000000e+00> : vector<2x8x8xf32>
    %82 = tpu.matmul %77, %79, %cst_22 {dimension_numbers = #tpu.dot_dimension_numbers<[2], [2], [1], [1], [0, 0, 0, 1, 1, 1], [0], [0]>} : vector<2x8x8xf32>, vector<2x8x8xf32>, vector<2x8x8xf32> -> vector<2x8x8xf32>
    "tpu.trace_stop"() : () -> ()
    %cst_23 = arith.constant 0.353553385 : f32
    %83 = vector.broadcast %cst_23 : f32 to vector<2x8x8xf32>
    %84 = arith.mulf %82, %83 : vector<2x8x8xf32>
    %85 = vector.shape_cast %6 : vector<8x8xf32> to vector<1x8x8xf32>
    %86 = vector.broadcast %85 : vector<1x8x8xf32> to vector<2x8x8xf32>
    %87 = arith.addf %84, %86 : vector<2x8x8xf32>
    %cst_24 = arith.constant dense<0xFF800000> : vector<2x8xf32>
    %88 = vector.multi_reduction <maximumf>, %87, %cst_24 [2] : vector<2x8x8xf32> to vector<2x8xf32>
    %89 = vector.shape_cast %88 : vector<2x8xf32> to vector<2x8x1xf32>
    %90 = vector.broadcast %89 : vector<2x8x1xf32> to vector<2x8x8xf32>
    %91 = arith.subf %87, %90 : vector<2x8x8xf32>
    %92 = math.exp %91 : vector<2x8x8xf32>
    %cst_25 = arith.constant dense<0.000000e+00> : vector<2x8xf32>
    %93 = vector.multi_reduction <add>, %92, %cst_25 [2] : vector<2x8x8xf32> to vector<2x8xf32>
    %94 = vector.shape_cast %93 : vector<2x8xf32> to vector<2x8x1xf32>
    %95 = tpu.reciprocal %94 {approx = true} : vector<2x8x1xf32> -> vector<2x8x1xf32>
    %96 = vector.broadcast %95 : vector<2x8x1xf32> to vector<2x8x8xf32>
    %97 = arith.mulf %92, %96 : vector<2x8x8xf32>
    "tpu.trace_start"() <{level = 10 : i32, message = "bqk,bkd->bqd"}> : () -> ()
    %cst_26 = arith.constant dense<0.000000e+00> : vector<2x8x8xf32>
    %98 = tpu.matmul %97, %81, %cst_26 {dimension_numbers = #tpu.dot_dimension_numbers<[2], [1], [1], [2], [0, 0, 0, 1, 1, 2], [0], [0]>} : vector<2x8x8xf32>, vector<2x8x8xf32>, vector<2x8x8xf32> -> vector<2x8x8xf32>
    "tpu.trace_stop"() : () -> ()
    %99 = tpu.concatenate %29, %52, %75, %98 in 2 : vector<2x8x8xf32>, vector<2x8x8xf32>, vector<2x8x8xf32>, vector<2x8x8xf32> -> vector<2x8x32xf32>
    %100 = vector.shape_cast %99 : vector<2x8x32xf32> to vector<16x32xf32>
    %c0_27 = arith.constant 0 : index
    %c0_28 = arith.constant 0 : index
    %101 = vector.load %arg5[%c0_27, %c0_28] : memref<32x32xf32, #tpu.memory_space<vmem>>, vector<32x32xf32>
    %cst_29 = arith.constant dense<0.000000e+00> : vector<16x32xf32>
    %102 = tpu.matmul %100, %101, %cst_29 {dimension_numbers = #tpu.dot_dimension_numbers<[1], [0], [0], [1], [0, 0, 1, 1], [], []>} : vector<16x32xf32>, vector<32x32xf32>, vector<16x32xf32> -> vector<16x32xf32>
    %c0_30 = arith.constant 0 : index
    %c0_31 = arith.constant 0 : index
    %103 = vector.load %arg6[%c0_30, %c0_31] : memref<1x32xf32, #tpu.memory_space<vmem>>, vector<1x32xf32>
    %104 = vector.broadcast %103 : vector<1x32xf32> to vector<16x32xf32>
    %105 = arith.addf %102, %104 : vector<16x32xf32>
    %106 = arith.addf %0, %105 : vector<16x32xf32>
    %cst_32 = arith.constant dense<0.000000e+00> : vector<16xf32>
    %107 = vector.multi_reduction <add>, %106, %cst_32 [1] : vector<16x32xf32> to vector<16xf32>
    %108 = vector.shape_cast %107 : vector<16xf32> to vector<16x1xf32>
    %cst_33 = arith.constant 3.200000e+01 : f32
    %109 = vector.broadcast %cst_33 : f32 to vector<16x1xf32>
    %110 = arith.divf %108, %109 : vector<16x1xf32>
    %111 = vector.broadcast %110 : vector<16x1xf32> to vector<16x32xf32>
    %112 = arith.subf %106, %111 : vector<16x32xf32>
    %113 = arith.mulf %112, %112 : vector<16x32xf32>
    %cst_34 = arith.constant dense<0.000000e+00> : vector<16xf32>
    %114 = vector.multi_reduction <add>, %113, %cst_34 [1] : vector<16x32xf32> to vector<16xf32>
    %115 = vector.shape_cast %114 : vector<16xf32> to vector<16x1xf32>
    %cst_35 = arith.constant 3.200000e+01 : f32
    %116 = vector.broadcast %cst_35 : f32 to vector<16x1xf32>
    %117 = arith.divf %115, %116 : vector<16x1xf32>
    %118 = vector.broadcast %110 : vector<16x1xf32> to vector<16x32xf32>
    %119 = arith.subf %106, %118 : vector<16x32xf32>
    %cst_36 = arith.constant 9.99999974E-6 : f32
    %120 = vector.broadcast %cst_36 : f32 to vector<16x1xf32>
    %121 = arith.addf %117, %120 : vector<16x1xf32>
    %122 = math.rsqrt %121 : vector<16x1xf32>
    %123 = vector.broadcast %122 : vector<16x1xf32> to vector<16x32xf32>
    %124 = arith.mulf %119, %123 : vector<16x32xf32>
    %c0_37 = arith.constant 0 : index
    %c0_38 = arith.constant 0 : index
    %125 = vector.load %arg7[%c0_37, %c0_38] : memref<1x32xf32, #tpu.memory_space<vmem>>, vector<1x32xf32>
    %126 = vector.broadcast %125 : vector<1x32xf32> to vector<16x32xf32>
    %127 = arith.mulf %124, %126 : vector<16x32xf32>
    %c0_39 = arith.constant 0 : index
    %c0_40 = arith.constant 0 : index
    %128 = vector.load %arg8[%c0_39, %c0_40] : memref<1x32xf32, #tpu.memory_space<vmem>>, vector<1x32xf32>
    %129 = vector.broadcast %128 : vector<1x32xf32> to vector<16x32xf32>
    %130 = arith.addf %127, %129 : vector<16x32xf32>
    %c0_41 = arith.constant 0 : index
    %c0_42 = arith.constant 0 : index
    %131 = vector.load %arg9[%c0_41, %c0_42] : memref<32x64xf32, #tpu.memory_space<vmem>>, vector<32x64xf32>
    %cst_43 = arith.constant dense<0.000000e+00> : vector<16x64xf32>
    %132 = tpu.matmul %130, %131, %cst_43 {dimension_numbers = #tpu.dot_dimension_numbers<[1], [0], [0], [1], [0, 0, 1, 1], [], []>} : vector<16x32xf32>, vector<32x64xf32>, vector<16x64xf32> -> vector<16x64xf32>
    %c0_44 = arith.constant 0 : index
    %c0_45 = arith.constant 0 : index
    %133 = vector.load %arg10[%c0_44, %c0_45] : memref<1x64xf32, #tpu.memory_space<vmem>>, vector<1x64xf32>
    %134 = vector.broadcast %133 : vector<1x64xf32> to vector<16x64xf32>
    %135 = arith.addf %132, %134 : vector<16x64xf32>
    %cst_46 = arith.constant 0.000000e+00 : f32
    %136 = vector.broadcast %cst_46 : f32 to vector<16x64xf32>
    %137 = arith.maximumf %135, %136 : vector<16x64xf32>
    %c0_47 = arith.constant 0 : index
    %c0_48 = arith.constant 0 : index
    %138 = vector.load %arg11[%c0_47, %c0_48] : memref<64x32xf32, #tpu.memory_space<vmem>>, vector<64x32xf32>
    %cst_49 = arith.constant dense<0.000000e+00> : vector<16x32xf32>
    %139 = tpu.matmul %137, %138, %cst_49 {dimension_numbers = #tpu.dot_dimension_numbers<[1], [0], [0], [1], [0, 0, 1, 1], [], []>} : vector<16x64xf32>, vector<64x32xf32>, vector<16x32xf32> -> vector<16x32xf32>
    %c0_50 = arith.constant 0 : index
    %c0_51 = arith.constant 0 : index
    %140 = vector.load %arg12[%c0_50, %c0_51] : memref<1x32xf32, #tpu.memory_space<vmem>>, vector<1x32xf32>
    %141 = vector.broadcast %140 : vector<1x32xf32> to vector<16x32xf32>
    %142 = arith.addf %139, %141 : vector<16x32xf32>
    %143 = arith.addf %130, %142 : vector<16x32xf32>
    %cst_52 = arith.constant dense<0.000000e+00> : vector<16xf32>
    %144 = vector.multi_reduction <add>, %143, %cst_52 [1] : vector<16x32xf32> to vector<16xf32>
    %145 = vector.shape_cast %144 : vector<16xf32> to vector<16x1xf32>
    %cst_53 = arith.constant 3.200000e+01 : f32
    %146 = vector.broadcast %cst_53 : f32 to vector<16x1xf32>
    %147 = arith.divf %145, %146 : vector<16x1xf32>
    %148 = vector.broadcast %147 : vector<16x1xf32> to vector<16x32xf32>
    %149 = arith.subf %143, %148 : vector<16x32xf32>
    %150 = arith.mulf %149, %149 : vector<16x32xf32>
    %cst_54 = arith.constant dense<0.000000e+00> : vector<16xf32>
    %151 = vector.multi_reduction <add>, %150, %cst_54 [1] : vector<16x32xf32> to vector<16xf32>
    %152 = vector.shape_cast %151 : vector<16xf32> to vector<16x1xf32>
    %cst_55 = arith.constant 3.200000e+01 : f32
    %153 = vector.broadcast %cst_55 : f32 to vector<16x1xf32>
    %154 = arith.divf %152, %153 : vector<16x1xf32>
    %155 = vector.broadcast %147 : vector<16x1xf32> to vector<16x32xf32>
    %156 = arith.subf %143, %155 : vector<16x32xf32>
    %cst_56 = arith.constant 9.99999974E-6 : f32
    %157 = vector.broadcast %cst_56 : f32 to vector<16x1xf32>
    %158 = arith.addf %154, %157 : vector<16x1xf32>
    %159 = math.rsqrt %158 : vector<16x1xf32>
    %160 = vector.broadcast %159 : vector<16x1xf32> to vector<16x32xf32>
    %161 = arith.mulf %156, %160 : vector<16x32xf32>
    %c0_57 = arith.constant 0 : index
    %c0_58 = arith.constant 0 : index
    %162 = vector.load %arg13[%c0_57, %c0_58] : memref<1x32xf32, #tpu.memory_space<vmem>>, vector<1x32xf32>
    %163 = vector.broadcast %162 : vector<1x32xf32> to vector<16x32xf32>
    %164 = arith.mulf %161, %163 : vector<16x32xf32>
    %c0_59 = arith.constant 0 : index
    %c0_60 = arith.constant 0 : index
    %165 = vector.load %arg14[%c0_59, %c0_60] : memref<1x32xf32, #tpu.memory_space<vmem>>, vector<1x32xf32>
    %166 = vector.broadcast %165 : vector<1x32xf32> to vector<16x32xf32>
    %167 = arith.addf %164, %166 : vector<16x32xf32>
    %c0_61 = arith.constant 0 : index
    %c0_62 = arith.constant 0 : index
    %168 = vector.load %arg15[%c0_61, %c0_62] : memref<16x32xf32, #tpu.memory_space<vmem>>, vector<16x32xf32>
    tpu.vector_store %arg15[%c0_61, %c0_62], %167 {strides = array<i32>} : memref<16x32xf32, #tpu.memory_space<vmem>>, vector<16x32xf32>,
    return
  }
  func.func @transform_0(%arg0: i32) -> (i32, i32) {
    %c0_i32 = arith.constant 0 : i32
    %c0_i32_0 = arith.constant 0 : i32
    %c0_i32_1 = arith.constant 0 : i32
    return %c0_i32, %c0_i32_0 : i32, i32
  }
  func.func @transform_1(%arg0: i32) -> (i32, i32) {
    %c0_i32 = arith.constant 0 : i32
    %c0_i32_0 = arith.constant 0 : i32
    %c0_i32_1 = arith.constant 0 : i32
    return %c0_i32, %c0_i32_0 : i32, i32
  }
  func.func @transform_2(%arg0: i32) -> (i32, i32) {
    %c0_i32 = arith.constant 0 : i32
    %c0_i32_0 = arith.constant 0 : i32
    %c0_i32_1 = arith.constant 0 : i32
    return %c0_i32, %c0_i32_0 : i32, i32
  }
  func.func @transform_3(%arg0: i32) -> (i32, i32) {
    %c0_i32 = arith.constant 0 : i32
    %c0_i32_0 = arith.constant 0 : i32
    %c0_i32_1 = arith.constant 0 : i32
    return %c0_i32, %c0_i32_0 : i32, i32
  }
  func.func @transform_4(%arg0: i32) -> (i32, i32) {
    %c0_i32 = arith.constant 0 : i32
    %c0_i32_0 = arith.constant 0 : i32
    %c0_i32_1 = arith.constant 0 : i32
    return %c0_i32, %c0_i32_0 : i32, i32
  }
  func.func @transform_5(%arg0: i32) -> (i32, i32) {
    %c0_i32 = arith.constant 0 : i32
    %c0_i32_0 = arith.constant 0 : i32
    %c0_i32_1 = arith.constant 0 : i32
    return %c0_i32, %c0_i32_0 : i32, i32
  }
  func.func @transform_6(%arg0: i32) -> (i32, i32) {
    %c0_i32 = arith.constant 0 : i32
    %c0_i32_0 = arith.constant 0 : i32
    %c0_i32_1 = arith.constant 0 : i32
    return %c0_i32, %c0_i32_0 : i32, i32
  }
  func.func @transform_7(%arg0: i32) -> (i32, i32) {
    %c0_i32 = arith.constant 0 : i32
    %c0_i32_0 = arith.constant 0 : i32
    %c0_i32_1 = arith.constant 0 : i32
    return %c0_i32, %c0_i32_0 : i32, i32
  }
  func.func @transform_8(%arg0: i32) -> (i32, i32) {
    %c0_i32 = arith.constant 0 : i32
    %c0_i32_0 = arith.constant 0 : i32
    %c0_i32_1 = arith.constant 0 : i32
    return %c0_i32, %c0_i32_0 : i32, i32
  }
  func.func @transform_9(%arg0: i32) -> (i32, i32) {
    %c0_i32 = arith.constant 0 : i32
    %c0_i32_0 = arith.constant 0 : i32
    %c0_i32_1 = arith.constant 0 : i32
    return %c0_i32, %c0_i32_0 : i32, i32
  }
  func.func @transform_10(%arg0: i32) -> (i32, i32) {
    %c0_i32 = arith.constant 0 : i32
    %c0_i32_0 = arith.constant 0 : i32
    %c0_i32_1 = arith.constant 0 : i32
    return %c0_i32, %c0_i32_0 : i32, i32
  }
  func.func @transform_11(%arg0: i32) -> (i32, i32) {
    %c0_i32 = arith.constant 0 : i32
    %c0_i32_0 = arith.constant 0 : i32
    %c0_i32_1 = arith.constant 0 : i32
    return %c0_i32, %c0_i32_0 : i32, i32
  }
  func.func @transform_12(%arg0: i32) -> (i32, i32) {
    %c0_i32 = arith.constant 0 : i32
    %c0_i32_0 = arith.constant 0 : i32
    %c0_i32_1 = arith.constant 0 : i32
    return %c0_i32, %c0_i32_0 : i32, i32
  }
  func.func @transform_13(%arg0: i32) -> (i32, i32) {
    %c0_i32 = arith.constant 0 : i32
    %c0_i32_0 = arith.constant 0 : i32
    %c0_i32_1 = arith.constant 0 : i32
    return %c0_i32, %c0_i32_0 : i32, i32
  }
  func.func @transform_14(%arg0: i32) -> (i32, i32) {
    %c0_i32 = arith.constant 0 : i32
    %c0_i32_0 = arith.constant 0 : i32
    %c0_i32_1 = arith.constant 0 : i32
    return %c0_i32, %c0_i32_0 : i32, i32
  }
}

</mosaic_0001>

<bundles_post_ra>
// kernel: tpu_custom_call.1
= control target key start
LH: loop header
LB: loop body
LE: loop exit
PB: predicated region body
PF: predicated region fallthrough
CT: control target
= control target key end

     0   :  { %19 = vsyncpa [#allocation3], 0  ;;  %s2651_s0 = inlined_call_operand.hbm [shape: f32[16,32], index: 0, kind: input, shape index: {}]   ;;  %s2652_s1 = inlined_call_operand.hbm [shape: f32[8,8], index: 1, kind: input, shape index: {}]   ;;  %s2653_s2 = inlined_call_operand.vmem [shape: f32[32,96], index: 2, kind: input, shape index: {}]   ;;  %s2654_s3 = inlined_call_operand.vmem [shape: f32[1,96], index: 3, kind: input, shape index: {}]   ;;  %s2655_s4 = inlined_call_operand.vmem [shape: f32[32,32], index: 4, kind: input, shape index: {}]   ;;  %s2656_s5 = inlined_call_operand.vmem [shape: f32[1,32], index: 5, kind: input, shape index: {}]   ;;  %s2657_s6 = inlined_call_operand.vmem [shape: f32[1,32], index: 6, kind: input, shape index: {}]   ;;  %s2658_s7 = inlined_call_operand.vmem [shape: f32[1,32], index: 7, kind: input, shape index: {}]   ;;  %s2659_s8 = inlined_call_operand.vmem [shape: f32[32,64], index: 8, kind: input, shape index: {}]   ;;  %s2660_s9 = inlined_call_operand.vmem [shape: f32[1,64], index: 9, kind: input, shape index: {}]   ;;  %s2661_s10 = inlined_call_operand.vmem [shape: f32[64,32], index: 10, kind: input, shape index: {}]   ;;  %s2662_s11 = inlined_call_operand.vmem [shape: f32[1,32], index: 11, kind: input, shape index: {}]   ;;  %s2663_s12 = inlined_call_operand.vmem [shape: f32[1,32], index: 12, kind: input, shape index: {}]   ;;  %s2664_s13 = inlined_call_operand.vmem [shape: f32[1,32], index: 13, kind: input, shape index: {}]   ;;  %s2665_s14 = inlined_call_operand.hbm [shape: f32[16,32], index: 14, kind: output, shape index: {}]  }
   0x1   :  { %20 = vsyncpa [#allocation6], 0 }
   0x2   :  { %21 = vsyncpa [#allocation4], 0  ;;  %s2291_s29 = smov [#allocation2]  }
   0x3   :  { %s27_s30 = sshll.u32 %s2291_s29, 4  ;;  %s28_s30 = int_to_ptr.vmem [resolvable:$true] %s27_s30 }
   0x4   :  { %s2233_s15 = scalar_lea.vmem %s28_s30, 256  ;;  %p2238_p1 = scmp.lt.s32.totalorder %s28_s30, %s28_s30 }
   0x5   :  { %p2234_p0 = scmp.ne.s32.totalorder %s28_s30, %s2233_s15  ;;  %p2239_p2 = scmp.lt.s32.totalorder %s2233_s15, %s2233_s15 }
   0x7   :  { %p2240_p3 = por %p2239_p2, %p2238_p1 }
   0x9   :  { %p2241_p4 = pnand %p2240_p3, %p2234_p0 }
   0xb   :  { %2244 = shalt.err (!%p2241_p4)
}
   0xc   :  { %s2292_s16 = smov 128   ;;  %s2293_s17 = smov 8  }
   0xd   :  { %33 = dma.hbm_to_vmem [thread:$0]  %s2651_s0, 256, %s28_s30, [#allocation3], %s2292_s16, %s2292_s16, %s2293_s17  }
   0xe   :  { %s2294_s20 = smov [#allocation5]  }
   0xf   :  { %s40_s21 = sshll.u32 %s2294_s20, 4  ;;  %s41_s21 = int_to_ptr.vmem [resolvable:$true] %s40_s21 }
  0x10   :  { %s2253_s22 = scalar_lea.vmem %s41_s21, 128  ;;  %p2258_p6 = scmp.lt.s32.totalorder %s41_s21, %s41_s21 }
  0x11   :  { %p2254_p5 = scmp.ne.s32.totalorder %s41_s21, %s2253_s22  ;;  %p2259_p7 = scmp.lt.s32.totalorder %s2253_s22, %s2253_s22 }
  0x13   :  { %p2260_p8 = por %p2259_p7, %p2258_p6 }
  0x15   :  { %p2261_p9 = pnand %p2260_p8, %p2254_p5 }
  0x17   :  { %2264 = shalt.err (!%p2261_p9)
}
  0x18   :  { %43 = dma.hbm_to_vmem [thread:$0]  %s2652_s1, 128, %s41_s21, [#allocation6]  }
  0x19   :  { %2285 = dma.done.wait [#allocation3], 256  }
  0x1a   :  { %2286 = vsyncadd [#allocation3], 4294967040 }
  0x1b   :  { %2287 = dma.done.wait [#allocation6], 128  }
  0x1c   :  { %2288 = vsyncadd [#allocation6], 4294967168  ;;  %vm87_vm0 = vcmask 261120   ;;  %v79_v0 = vld [vmem:[%s2653_s2 + $0x18] sm:$0xff]  ;;  %v78_v1 = vld [vmem:[%s2653_s2 + $0x10] sm:$0xff]  ;;  %v2295_v6 = vmov 0.0  }
  0x1d   :  { %2033 = vmatprep.subr.mxu1 %v79_v0  ;;  %v2401_v2 = vld [vmem:[#allocation2] sm:$0xff]  ;;  %v77_v3 = vld [vmem:[%s2653_s2 + $0x8] sm:$0xff]  ;;  %2054 = vmatprep.subr.mxu0 %v2295_v6  ;;  %vm2296_vm1 = vmmov 0   ;;  %s2297_s18 = smov 96   ;;  %vm173_vm2 = vcmask 64512   ;;  %v2442_v15 = vld [vmem:[#allocation5] sm:$0xff] }
  0x1e   :  { %2034 = vmatpush3.msra.mxu1 %v79_v0  ;;  %2041 = vmatprep.mubr.msk.f32.mxu1 %vm87_vm0, %v2401_v2  ;;  %v76_v4 = vld [vmem:[%s2653_s2] sm:$0xff]  ;;  %v2411_v5 = vld [vmem:[#allocation2 + $0x8] sm:$0xff]  ;;  %s2299_s19 = smov 88   ;;  %s2300_s20 = smov 120   ;;  %vm1534_vm3 = vcmask 195584   ;;  %vm1531_vm4 = vcmask 130048  }
  0x1f   :  { %2035 = vmatprep.subr.mxu1 %v78_v1  ;;  %2056 = vmatprep.mubr.msk.f32.mxu0 %vm2296_vm1, %v2295_v6  ;;  %v1933_v8 = vld [vmem:[%s2654_s3] ss:$0 sm:$0xff]  ;;  %s2298_s3 = smov 64   ;;  %s2301_s21 = smov 56   ;;  %vm1785_vm5 = vcmask 523264  }
  0x20   :  { %2036 = vmatpush3.msra.mxu1 %v78_v1  ;;  %s2302_s22 = smov 80   ;;  %s2303_s23 = smov 112  }
  0x21   :  { %2037 = vmatprep.subr.mxu1 %v77_v3  ;;  %s2304_s24 = smov 48   ;;  %s2305_s0 = smov 72  }
  0x22   :  { %2038 = vmatpush3.msra.mxu1 %v77_v3  ;;  %s2306_s25 = smov 104   ;;  %s2307_s26 = smov 40  }
  0x23   :  { %2039 = vmatprep.subr.mxu1 %v76_v4  ;;  %s2308_s27 = smov 16   ;;  %s2310_s29 = smov [#allocation7]  }
  0x24   :  { %2040 = vmatpush3.msra.mxu1 %v76_v4  ;;  %s1920_s1 = sshll.u32 %s2310_s29, 4  ;;  %s1921_s1 = int_to_ptr.vmem [resolvable:$true] %s1920_s1 }
  0x25   :  { %2042 = vmatmul.mubr.msk.f32.vlgmr.msra.gmra.mxu1 %vm87_vm0, %v2411_v5  ;;  %2044 = vmatprep.subr.mxu1 %v2295_v6  ;;  %s2265_s30 = scalar_lea.vmem %s1921_s1, 256  ;;  %p2270_p11 = scmp.lt.s32.totalorder %s1921_s1, %s1921_s1 }
  0x26   :  { %2046 = vmatprep.mubr.msk.f32.mxu1 %vm2296_vm1, %v2295_v6  ;;  %p2266_p10 = scmp.ne.s32.totalorder %s1921_s1, %s2265_s30  ;;  %p2271_p12 = scmp.lt.s32.totalorder %s2265_s30, %s2265_s30 }
  0x28   :  { %p2272_p13 = por %p2271_p12, %p2270_p11 }
  0x2a   :  { %p2273_p0 = pnand %p2272_p13, %p2266_p10 }
  0xe5   :  { %v2043_v7 = vpop.f32.mrf.mxu1 }
  0xe6   :  { %v2427_v11 = vadd.f32 %v2043_v7, %v1933_v8 }
  0xe7   :  { %v160_v9 = vpop.f32.mrf.mxu1 }
  0xe8   :  { %v2424_v10 = vadd.f32 %v1933_v8, %v160_v9 }
  0xea   :  { %171 = vrot.lane.b32.xlu0 %v2424_v10, %s2297_s18 }
  0xee   :  { %249 = vrot.lane.b32.xlu0 %v2427_v11, %s2297_s18 }
 0x15c   :  { %v172_v12 = vpop.permute.xlu0 %171 }
 0x15d   :  { %2045 = vmatpush3.xpose.msk.msra.mxu1 %vm173_vm2, %v172_v12 }
 0x15e   :  { %2049 = vmatprep.subr.mxu1 %v2295_v6 }
 0x160   :  { %2047 = vmatmul.mubr.msk.f32.vlgmr.msra.gmra.mxu1 %vm173_vm2, %v2424_v10  ;;  %v250_v13 = vpop.permute.xlu0 %249 }
 0x161   :  { %2050 = vmatpush3.xpose.msk.msra.mxu1 %vm173_vm2, %v250_v13  ;;  %2051 = vmatprep.mubr.msk.f32.mxu1 %vm2296_vm1, %v2295_v6 }
 0x162   :  { %2059 = vmatprep.subr.mxu1 %v2295_v6 }
 0x164   :  { %2052 = vmatmul.mubr.msk.f32.vlgmr.msra.gmra.mxu1 %vm173_vm2, %v2427_v11 }
 0x165   :  { %2061 = vmatprep.mubr.msk.f32.mxu1 %vm2296_vm1, %v2295_v6 }
 0x220   :  { %v244_v14 = vpop.f32.mrf.mxu1 }
 0x221   :  { %v325_v16 = vmul.f32 0.35355338, %v244_v14 }
 0x222   :  { %v2048_v17 = vpop.f32.mrf.mxu1 }
 0x223   :  { %v327_v18 = vadd.f32 %v325_v16, %v2442_v15 }
 0x224   :  { %v321_v19 = vpop.f32.mrf.mxu1 }
 0x225   :  { %v326_v20 = vmul.f32 0.35355338, %v321_v19  ;;  %v329_v21 = vsel %vm173_vm2, %v327_v18, -inf }
 0x226   :  { %330 = vmax.xlane.f32.xlu1 %v329_v21  ;;  %v2053_v22 = vpop.f32.mrf.mxu1 }
 0x227   :  { %v328_v23 = vadd.f32 %v326_v20, %v2442_v15 }
 0x229   :  { %v332_v24 = vsel %vm173_vm2, %v328_v23, -inf }
 0x22a   :  { %333 = vmax.xlane.f32.xlu1 %v332_v24 }
 0x23b   :  { %351 = vrot.lane.b32.xlu1 %v2424_v10, %s2298_s3 }
 0x23f   :  { %427 = vrot.lane.b32.xlu1 %v2427_v11, %s2298_s3 }
 0x243   :  { %505 = vrot.lane.b32.xlu1 %v2424_v10, %s2299_s19 }
 0x247   :  { %583 = vrot.lane.b32.xlu1 %v2427_v11, %s2299_s19  ;;  %s2309_s19 = smov 24  }
 0x2af   :  { %v331_v25 = vpop.xlane.xlu1 %330 }
 0x2b0   :  { %v335_v26 = vsub.f32 %v327_v18, %v331_v25 }
 0x2b2   :  { %v337_v27 = vmul.f32 1.442695, %v335_v26 }
 0x2b3   :  { %v334_v28 = vpop.xlane.xlu1 %333 }
 0x2b4   :  { %2185 = vpow2.f32 %v337_v27  ;;  %v336_v29 = vsub.f32 %v328_v23, %v334_v28 }
 0x2b6   :  { %v339_v30 = vmul.f32 1.442695, %v336_v29 }
 0x2b7   :  { %v352_v31 = vpop.permute.xlu1 %351 }
 0x2b8   :  { %2187 = vpow2.f32 %v339_v30  ;;  %2055 = vmatpush3.msra.mxu0 %v352_v31 }
 0x2b9   :  { %2064 = vmatprep.subr.mxu0 %v2295_v6 }
 0x2bb   :  { %v428_v32 = vpop.permute.xlu1 %427 }
 0x2bc   :  { %2060 = vmatpush3.msra.mxu1 %v428_v32 }
 0x2bd   :  { %2069 = vmatprep.subr.mxu1 %v2295_v6 }
 0x2bf   :  { %v506_v37 = vpop.permute.xlu1 %505 }
 0x2c1   :  { %v2186_v33 = vpop.eup %2185 }
 0x2c2   :  { %v341_v34 = vsel %vm173_vm2, %v2186_v33, 0.0 }
 0x2c3   :  { %342 = vadd.xlane.f32.xlu0 %v341_v34  ;;  %v584_v38 = vpop.permute.xlu1 %583 }
 0x2c5   :  { %v2188_v35 = vpop.eup %2187 }
 0x2c6   :  { %v344_v36 = vsel %vm173_vm2, %v2188_v35, 0.0 }
 0x2c7   :  { %345 = vadd.xlane.f32.xlu1 %v344_v36 }
 0x2d8   :  { %581 = vrot.lane.b32.xlu1 %v2427_v11, %s2300_s20 }
 0x2d9   :  { %503 = vrot.lane.b32.xlu0 %v2424_v10, %s2300_s20 }
 0x34c   :  { %v343_v39 = vpop.xlane.xlu0 %342 }
 0x34d   :  { %2189 = vrcp.f32 %v343_v39 }
 0x350   :  { %v346_v40 = vpop.xlane.xlu1 %345  ;;  %v504_v45 = vpop.permute.xlu0 %503 }
 0x351   :  { %2191 = vrcp.f32 %v346_v40 }
 0x354   :  { %v582_v46 = vpop.permute.xlu1 %581 }
 0x35a   :  { %v2190_v41 = vpop.eup %2189 }
 0x35b   :  { %v349_v42 = vmul.f32 %v2190_v41, %v2186_v33 }
 0x35d   :  { %2057 = vmatmul.mubr.msk.f32.vlgmr.msra.gmra.mxu0 %vm173_vm2, %v349_v42 }
 0x35e   :  { %v2192_v43 = vpop.eup %2191  ;;  %2065 = vmatpush3.xpose.msk.msra.mxu0 %vm173_vm2, %v506_v37  ;;  %2066 = vmatprep.mubr.msk.f32.mxu0 %vm2296_vm1, %v2295_v6 }
 0x35f   :  { %v350_v44 = vmul.f32 %v2192_v43, %v2188_v35  ;;  %2074 = vmatprep.subr.mxu0 %v2295_v6 }
 0x361   :  { %2062 = vmatmul.mubr.msk.f32.vlgmr.msra.gmra.mxu1 %vm173_vm2, %v350_v44  ;;  %2067 = vmatmul.mubr.msk.f32.vlgmr.msra.gmra.mxu0 %vm173_vm2, %v504_v45 }
 0x362   :  { %2070 = vmatpush3.xpose.msk.msra.mxu1 %vm173_vm2, %v584_v38  ;;  %2071 = vmatprep.mubr.msk.f32.mxu1 %vm2296_vm1, %v2295_v6 }
 0x363   :  { %2079 = vmatprep.subr.mxu1 %v2295_v6  ;;  %2076 = vmatprep.mubr.msk.f32.mxu0 %vm2296_vm1, %v2295_v6 }
 0x365   :  { %2072 = vmatmul.mubr.msk.f32.vlgmr.msra.gmra.mxu1 %vm173_vm2, %v582_v46 }
 0x366   :  { %2081 = vmatprep.mubr.msk.f32.mxu1 %vm2296_vm1, %v2295_v6 }
 0x41d   :  { %v2474_v47 = vpop.f32.mrf.mxu0 }
 0x41f   :  { %v2058_v48 = vpop.f32.mrf.mxu0 }
 0x421   :  { %v2476_v49 = vpop.f32.mrf.mxu1  ;;  %v577_v50 = vpop.f32.mrf.mxu0 }
 0x422   :  { %v659_v51 = vmul.f32 0.35355338, %v577_v50 }
 0x423   :  { %v2063_v52 = vpop.f32.mrf.mxu1  ;;  %v2068_v53 = vpop.f32.mrf.mxu0 }
 0x424   :  { %v661_v54 = vadd.f32 %v659_v51, %v2442_v15 }
 0x425   :  { %v655_v55 = vpop.f32.mrf.mxu1 }
 0x426   :  { %v660_v56 = vmul.f32 0.35355338, %v655_v55  ;;  %v663_v57 = vsel %vm173_vm2, %v661_v54, -inf }
 0x427   :  { %v2073_v58 = vpop.f32.mrf.mxu1  ;;  %664 = vmax.xlane.f32.xlu1 %v663_v57 }
 0x428   :  { %v662_v59 = vadd.f32 %v660_v56, %v2442_v15 }
 0x42a   :  { %v666_v60 = vsel %vm173_vm2, %v662_v59, -inf }
 0x42b   :  { %667 = vmax.xlane.f32.xlu0 %v666_v60 }
 0x438   :  { %685 = vrot.lane.b32.xlu1 %v2424_v10, %s2301_s21 }
 0x43c   :  { %839 = vrot.lane.b32.xlu1 %v2424_v10, %s2302_s22 }
 0x440   :  { %917 = vrot.lane.b32.xlu1 %v2427_v11, %s2302_s22 }
 0x441   :  { %761 = vrot.lane.b32.xlu0 %v2427_v11, %s2301_s21 }
 0x445   :  { %837 = vrot.lane.b32.xlu0 %v2424_v10, %s2303_s23 }
 0x4b0   :  { %v665_v61 = vpop.xlane.xlu1 %664 }
 0x4b1   :  { %v669_v62 = vsub.f32 %v661_v54, %v665_v61 }
 0x4b3   :  { %v671_v63 = vmul.f32 1.442695, %v669_v62 }
 0x4b4   :  { %v686_v0 = vpop.permute.xlu1 %685  ;;  %v668_v1 = vpop.xlane.xlu0 %667 }
 0x4b5   :  { %2193 = vpow2.f32 %v671_v63  ;;  %v670_v3 = vsub.f32 %v662_v59, %v668_v1  ;;  %2075 = vmatpush3.msra.mxu0 %v686_v0 }
 0x4b6   :  { %2084 = vmatprep.subr.mxu0 %v2295_v6 }
 0x4b7   :  { %v673_v4 = vmul.f32 1.442695, %v670_v3 }
 0x4b8   :  { %v762_v7 = vpop.permute.xlu0 %761  ;;  %v840_v14 = vpop.permute.xlu1 %839 }
 0x4b9   :  { %2195 = vpow2.f32 %v673_v4  ;;  %2080 = vmatpush3.msra.mxu1 %v762_v7 }
 0x4ba   :  { %2089 = vmatprep.subr.mxu1 %v2295_v6 }
 0x4bc   :  { %v918_v16 = vpop.permute.xlu1 %917  ;;  %v838_v23 = vpop.permute.xlu0 %837 }
 0x4c2   :  { %v2194_v8 = vpop.eup %2193 }
 0x4c3   :  { %v675_v9 = vsel %vm173_vm2, %v2194_v8, 0.0 }
 0x4c4   :  { %676 = vadd.xlane.f32.xlu1 %v675_v9 }
 0x4c6   :  { %v2196_v12 = vpop.eup %2195 }
 0x4c7   :  { %v678_v13 = vsel %vm173_vm2, %v2196_v12, 0.0 }
 0x4c8   :  { %679 = vadd.xlane.f32.xlu1 %v678_v13 }
 0x4d9   :  { %915 = vrot.lane.b32.xlu1 %v2427_v11, %s2303_s23 }
 0x54d   :  { %v677_v17 = vpop.xlane.xlu1 %676 }
 0x54e   :  { %2197 = vrcp.f32 %v677_v17 }
 0x551   :  { %v680_v18 = vpop.xlane.xlu1 %679 }
 0x552   :  { %2199 = vrcp.f32 %v680_v18 }
 0x555   :  { %v916_v24 = vpop.permute.xlu1 %915 }
 0x55b   :  { %v2198_v19 = vpop.eup %2197 }
 0x55c   :  { %v683_v20 = vmul.f32 %v2198_v19, %v2194_v8 }
 0x55e   :  { %2077 = vmatmul.mubr.msk.f32.vlgmr.msra.gmra.mxu0 %vm173_vm2, %v683_v20 }
 0x55f   :  { %v2200_v21 = vpop.eup %2199  ;;  %2085 = vmatpush3.xpose.msk.msra.mxu0 %vm173_vm2, %v840_v14  ;;  %2086 = vmatprep.mubr.msk.f32.mxu0 %vm2296_vm1, %v2295_v6 }
 0x560   :  { %v684_v22 = vmul.f32 %v2200_v21, %v2196_v12  ;;  %2094 = vmatprep.subr.mxu0 %v2295_v6 }
 0x562   :  { %2082 = vmatmul.mubr.msk.f32.vlgmr.msra.gmra.mxu1 %vm173_vm2, %v684_v22  ;;  %2087 = vmatmul.mubr.msk.f32.vlgmr.msra.gmra.mxu0 %vm173_vm2, %v838_v23 }
 0x563   :  { %2090 = vmatpush3.xpose.msk.msra.mxu1 %vm173_vm2, %v918_v16  ;;  %2091 = vmatprep.mubr.msk.f32.mxu1 %vm2296_vm1, %v2295_v6 }
 0x564   :  { %2099 = vmatprep.subr.mxu1 %v2295_v6  ;;  %2096 = vmatprep.mubr.msk.f32.mxu0 %vm2296_vm1, %v2295_v6 }
 0x566   :  { %2092 = vmatmul.mubr.msk.f32.vlgmr.msra.gmra.mxu1 %vm173_vm2, %v916_v24 }
 0x567   :  { %2101 = vmatprep.mubr.msk.f32.mxu1 %vm2296_vm1, %v2295_v6 }
 0x61e   :  { %v2508_v25 = vpop.f32.mrf.mxu0 }
 0x620   :  { %v2078_v26 = vpop.f32.mrf.mxu0 }
 0x622   :  { %v2510_v27 = vpop.f32.mrf.mxu1  ;;  %v911_v28 = vpop.f32.mrf.mxu0 }
 0x623   :  { %v993_v29 = vmul.f32 0.35355338, %v911_v28 }
 0x624   :  { %v2083_v30 = vpop.f32.mrf.mxu1  ;;  %v2088_v31 = vpop.f32.mrf.mxu0 }
 0x625   :  { %v995_v32 = vadd.f32 %v993_v29, %v2442_v15 }
 0x626   :  { %v989_v33 = vpop.f32.mrf.mxu1 }
 0x627   :  { %v994_v34 = vmul.f32 0.35355338, %v989_v33  ;;  %v997_v35 = vsel %vm173_vm2, %v995_v32, -inf }
 0x628   :  { %v2093_v36 = vpop.f32.mrf.mxu1  ;;  %998 = vmax.xlane.f32.xlu0 %v997_v35  ;;  %v1538_v35 = vld [vmem:[%s2655_s4 + $0x8] sm:$0xff] }
 0x629   :  { %v996_v37 = vadd.f32 %v994_v34, %v2442_v15  ;;  %v1540_v34 = vld [vmem:[%s2655_s4 + $0x18] sm:$0xff]  ;;  %v1537_v36 = vld [vmem:[%s2655_s4] sm:$0xff] }
 0x62b   :  { %v1000_v38 = vsel %vm173_vm2, %v996_v37, -inf }
 0x62c   :  { %1001 = vmax.xlane.f32.xlu1 %v1000_v38 }
 0x63d   :  { %1019 = vrot.lane.b32.xlu1 %v2424_v10, %s2304_s24 }
 0x63e   :  { %1095 = vrot.lane.b32.xlu0 %v2427_v11, %s2304_s24 }
 0x641   :  { %1173 = vrot.lane.b32.xlu1 %v2424_v10, %s2305_s0 }
 0x645   :  { %1251 = vrot.lane.b32.xlu1 %v2427_v11, %s2305_s0 }
 0x649   :  { %1249 = vrot.lane.b32.xlu1 %v2427_v11, %s2306_s25 }
 0x6b1   :  { %v999_v39 = vpop.xlane.xlu0 %998 }
 0x6b2   :  { %v1003_v40 = vsub.f32 %v995_v32, %v999_v39 }
 0x6b4   :  { %v1005_v41 = vmul.f32 1.442695, %v1003_v40 }
 0x6b5   :  { %v1002_v42 = vpop.xlane.xlu1 %1001  ;;  %v1096_v43 = vpop.permute.xlu0 %1095 }
 0x6b6   :  { %2201 = vpow2.f32 %v1005_v41  ;;  %v1004_v44 = vsub.f32 %v996_v37, %v1002_v42  ;;  %2100 = vmatpush3.msra.mxu1 %v1096_v43 }
 0x6b7   :  { %2109 = vmatprep.subr.mxu1 %v2295_v6 }
 0x6b8   :  { %v1007_v45 = vmul.f32 1.442695, %v1004_v44 }
 0x6b9   :  { %v1020_v46 = vpop.permute.xlu1 %1019 }
 0x6ba   :  { %2203 = vpow2.f32 %v1007_v45  ;;  %2095 = vmatpush3.msra.mxu0 %v1020_v46 }
 0x6bb   :  { %2104 = vmatprep.subr.mxu0 %v2295_v6 }
 0x6bd   :  { %v1174_v55 = vpop.permute.xlu1 %1173 }
 0x6c1   :  { %v1252_v59 = vpop.permute.xlu1 %1251 }
 0x6c3   :  { %v2202_v48 = vpop.eup %2201 }
 0x6c4   :  { %v1009_v50 = vsel %vm173_vm2, %v2202_v48, 0.0 }
 0x6c5   :  { %1010 = vadd.xlane.f32.xlu0 %v1009_v50  ;;  %v1250_v62 = vpop.permute.xlu1 %1249 }
 0x6c7   :  { %v2204_v51 = vpop.eup %2203 }
 0x6c8   :  { %v1012_v52 = vsel %vm173_vm2, %v2204_v51, 0.0 }
 0x6c9   :  { %1013 = vadd.xlane.f32.xlu0 %v1012_v52 }
 0x6df   :  { %1171 = vrot.lane.b32.xlu0 %v2424_v10, %s2306_s25 }
 0x74e   :  { %v1011_v53 = vpop.xlane.xlu0 %1010 }
 0x74f   :  { %2205 = vrcp.f32 %v1011_v53 }
 0x752   :  { %v1014_v54 = vpop.xlane.xlu0 %1013 }
 0x753   :  { %2207 = vrcp.f32 %v1014_v54 }
 0x756   :  { %v1172_v61 = vpop.permute.xlu0 %1171 }
 0x75c   :  { %v2206_v56 = vpop.eup %2205 }
 0x75d   :  { %v1017_v57 = vmul.f32 %v2206_v56, %v2202_v48 }
 0x75f   :  { %2097 = vmatmul.mubr.msk.f32.vlgmr.msra.gmra.mxu0 %vm173_vm2, %v1017_v57 }
 0x760   :  { %v2208_v58 = vpop.eup %2207  ;;  %2105 = vmatpush3.xpose.msk.msra.mxu0 %vm173_vm2, %v1174_v55  ;;  %2106 = vmatprep.mubr.msk.f32.mxu0 %vm2296_vm1, %v2295_v6  ;;  %v1960_v55 = vld [vmem:[%s2656_s5] ss:$0 sm:$0xff] }
 0x761   :  { %v1018_v60 = vmul.f32 %v2208_v58, %v2204_v51  ;;  %2114 = vmatprep.subr.mxu0 %v2295_v6 }
 0x763   :  { %2102 = vmatmul.mubr.msk.f32.vlgmr.msra.gmra.mxu1 %vm173_vm2, %v1018_v60  ;;  %2107 = vmatmul.mubr.msk.f32.vlgmr.msra.gmra.mxu0 %vm173_vm2, %v1172_v61 }
 0x764   :  { %2110 = vmatpush3.xpose.msk.msra.mxu1 %vm173_vm2, %v1252_v59  ;;  %2111 = vmatprep.mubr.msk.f32.mxu1 %vm2296_vm1, %v2295_v6 }
 0x765   :  { %2119 = vmatprep.subr.mxu1 %v2295_v6  ;;  %2116 = vmatprep.mubr.msk.f32.mxu0 %vm2296_vm1, %v2295_v6 }
 0x767   :  { %2112 = vmatmul.mubr.msk.f32.vlgmr.msra.gmra.mxu1 %vm173_vm2, %v1250_v62 }
 0x768   :  { %2121 = vmatprep.mubr.msk.f32.mxu1 %vm2296_vm1, %v2295_v6 }
 0x81f   :  { %v1091_v63 = vpop.f32.mrf.mxu0 }
 0x821   :  { %v2098_v0 = vpop.f32.mrf.mxu0 }
 0x823   :  { %v1167_v1 = vpop.f32.mrf.mxu1  ;;  %v1245_v3 = vpop.f32.mrf.mxu0 }
 0x824   :  { %v1327_v4 = vmul.f32 0.35355338, %v1245_v3 }
 0x825   :  { %v2103_v7 = vpop.f32.mrf.mxu1  ;;  %v2108_v8 = vpop.f32.mrf.mxu0 }
 0x826   :  { %v1329_v9 = vadd.f32 %v1327_v4, %v2442_v15 }
 0x827   :  { %v1323_v12 = vpop.f32.mrf.mxu1 }
 0x828   :  { %v1328_v13 = vmul.f32 0.35355338, %v1323_v12  ;;  %v1331_v14 = vsel %vm173_vm2, %v1329_v9, -inf  ;;  %v1678_v12 = vld [vmem:[%s2659_s8 + $0x10] sm:$0xff] }
 0x829   :  { %v2113_v16 = vpop.f32.mrf.mxu1  ;;  %1332 = vmax.xlane.f32.xlu0 %v1331_v14  ;;  %v1676_v14 = vld [vmem:[%s2659_s8] sm:$0xff] }
 0x82a   :  { %v1330_v17 = vadd.f32 %v1328_v13, %v2442_v15  ;;  %v1677_v13 = vld [vmem:[%s2659_s8 + $0x8] sm:$0xff]  ;;  %v1777_v16 = vld [vmem:[%s2661_s10 + $0x38] sm:$0xff] }
 0x82c   :  { %v1334_v18 = vsel %vm173_vm2, %v1330_v17, -inf }
 0x82d   :  { %1335 = vmax.xlane.f32.xlu1 %v1334_v18  ;;  %v1775_v18 = vld [vmem:[%s2661_s10 + $0x28] sm:$0xff] }
 0x83e   :  { %1353 = vrot.lane.b32.xlu1 %v2424_v10, %s2307_s26 }
 0x842   :  { %1507 = vrot.lane.b32.xlu1 %v2508_v25, %s2293_s17 }
 0x846   :  { %1509 = vrot.lane.b32.xlu1 %v2510_v27, %s2293_s17 }
 0x84a   :  { %1517 = vrot.lane.b32.xlu1 %v1167_v1, %s2308_s27 }
 0x8b2   :  { %v1333_v6 = vpop.xlane.xlu0 %1332 }
 0x8b3   :  { %v1337_v19 = vsub.f32 %v1329_v9, %v1333_v6  ;;  %v1774_v6 = vld [vmem:[%s2661_s10 + $0x20] sm:$0xff] }
 0x8b5   :  { %v1339_v20 = vmul.f32 1.442695, %v1337_v19 }
 0x8b6   :  { %v1336_v21 = vpop.xlane.xlu1 %1335 }
 0x8b7   :  { %2209 = vpow2.f32 %v1339_v20  ;;  %v1338_v15 = vsub.f32 %v1330_v17, %v1336_v21  ;;  %v1776_v17 = vld [vmem:[%s2661_s10 + $0x30] sm:$0xff] }
 0x8b9   :  { %v1341_v22 = vmul.f32 1.442695, %v1338_v15 }
 0x8ba   :  { %v1354_v23 = vpop.permute.xlu1 %1353 }
 0x8bb   :  { %2211 = vpow2.f32 %v1341_v22  ;;  %2115 = vmatpush3.msra.mxu0 %v1354_v23 }
 0x8bc   :  { %2124 = vmatprep.subr.mxu0 %v1540_v34 }
 0x8be   :  { %v1508_v41 = vpop.permute.xlu1 %1507 }
 0x8bf   :  { %v1529_v44 = vsel %vm173_vm2, %v2474_v47, %v1508_v41 }
 0x8c2   :  { %v1510_v42 = vpop.permute.xlu1 %1509 }
 0x8c3   :  { %v1530_v51 = vsel %vm173_vm2, %v2476_v49, %v1510_v42 }
 0x8c4   :  { %v2210_v24 = vpop.eup %2209 }
 0x8c5   :  { %v1343_v10 = vsel %vm173_vm2, %v2210_v24, 0.0 }
 0x8c6   :  { %1344 = vadd.xlane.f32.xlu0 %v1343_v10  ;;  %v1518_v45 = vpop.permute.xlu1 %1517  ;;  %v1963_v10 = vld [vmem:[%s2657_s6] ss:$0 sm:$0xff] }
 0x8c7   :  { %v1533_v52 = vsel %vm1531_vm4, %v1530_v51, %v1518_v45 }
 0x8c8   :  { %v2212_v25 = vpop.eup %2211 }
 0x8c9   :  { %v1346_v26 = vsel %vm173_vm2, %v2212_v25, 0.0 }
 0x8ca   :  { %1347 = vadd.xlane.f32.xlu0 %v1346_v26  ;;  %v1964_v26 = vld [vmem:[%s2658_s7] ss:$0 sm:$0xff] }
 0x8e0   :  { %1429 = vrot.lane.b32.xlu0 %v2427_v11, %s2307_s26  ;;  %v1539_v11 = vld [vmem:[%s2655_s4 + $0x10] sm:$0xff] }
 0x8e4   :  { %1515 = vrot.lane.b32.xlu0 %v1091_v63, %s2308_s27 }
 0x94f   :  { %v1345_v27 = vpop.xlane.xlu0 %1344 }
 0x950   :  { %2213 = vrcp.f32 %v1345_v27 }
 0x953   :  { %v1348_v28 = vpop.xlane.xlu0 %1347 }
 0x954   :  { %2215 = vrcp.f32 %v1348_v28 }
 0x957   :  { %v1430_v29 = vpop.permute.xlu0 %1429 }
 0x958   :  { %2120 = vmatpush3.msra.mxu1 %v1430_v29 }
 0x95b   :  { %v1516_v43 = vpop.permute.xlu0 %1515 }
 0x95c   :  { %v1532_v46 = vsel %vm1531_vm4, %v1529_v44, %v1516_v43  ;;  %v1968_v43 = vld [vmem:[%s2662_s11] ss:$0 sm:$0xff] }
 0x95d   :  { %v2214_v30 = vpop.eup %2213 }
 0x95e   :  { %v1351_v31 = vmul.f32 %v2214_v30, %v2210_v24 }
 0x960   :  { %2117 = vmatmul.mubr.msk.f32.vlgmr.msra.gmra.mxu0 %vm173_vm2, %v1351_v31 }
 0x961   :  { %v2216_v32 = vpop.eup %2215  ;;  %2125 = vmatpush3.msra.mxu0 %v1540_v34  ;;  %v1772_v34 = vld [vmem:[%s2661_s10 + $0x10] sm:$0xff] }
 0x962   :  { %v1352_v33 = vmul.f32 %v2216_v32, %v2212_v25  ;;  %2126 = vmatprep.subr.mxu0 %v1539_v11 }
 0x963   :  { %2127 = vmatpush3.msra.mxu0 %v1539_v11  ;;  %v1771_v11 = vld [vmem:[%s2661_s10 + $0x8] sm:$0xff] }
 0x964   :  { %2122 = vmatmul.mubr.msk.f32.vlgmr.msra.gmra.mxu1 %vm173_vm2, %v1352_v33  ;;  %2128 = vmatprep.subr.mxu0 %v1538_v35  ;;  %v1773_v33 = vld [vmem:[%s2661_s10 + $0x18] sm:$0xff] }
 0x965   :  { %2129 = vmatpush3.msra.mxu0 %v1538_v35  ;;  %v1770_v35 = vld [vmem:[%s2661_s10] sm:$0xff] }
 0x966   :  { %2130 = vmatprep.subr.mxu0 %v1537_v36 }
 0x967   :  { %2131 = vmatpush3.msra.mxu0 %v1537_v36  ;;  %v1965_v36 = vld [vmem:[%s2660_s9] ss:$0 sm:$0xff] }
 0x968   :  { %2146 = vmatprep.subr.mxu0 %v1777_v16 }
 0xa20   :  { %v1425_v37 = vpop.f32.mrf.mxu0 }
 0xa21   :  { %1523 = vrot.lane.b32.xlu0 %v1425_v37, %s2309_s19 }
 0xa22   :  { %v2118_v38 = vpop.f32.mrf.mxu0 }
 0xa24   :  { %v1501_v39 = vpop.f32.mrf.mxu1 }
 0xa25   :  { %1525 = vrot.lane.b32.xlu1 %v1501_v39, %s2309_s19 }
 0xa26   :  { %v2123_v40 = vpop.f32.mrf.mxu1 }
 0xa93   :  { %v1524_v48 = vpop.permute.xlu0 %1523 }
 0xa94   :  { %v1535_v50 = vsel %vm1534_vm3, %v1532_v46, %v1524_v48 }
 0xa95   :  { %2132 = vmatprep.mubr.msk.f32.mxu0 %vm87_vm0, %v1535_v50 }
 0xa97   :  { %v1526_v53 = vpop.permute.xlu1 %1525 }
 0xa98   :  { %v1536_v54 = vsel %vm1534_vm3, %v1533_v52, %v1526_v53 }
 0xa99   :  { %2133 = vmatmul.mubr.msk.f32.vlgmr.msra.gmra.mxu0 %vm87_vm0, %v1536_v54 }
 0xa9a   :  { %2147 = vmatpush3.msra.mxu0 %v1777_v16 }
 0xa9b   :  { %2148 = vmatprep.subr.mxu0 %v1776_v17 }
 0xa9c   :  { %2149 = vmatpush3.msra.mxu0 %v1776_v17 }
 0xa9d   :  { %2150 = vmatprep.subr.mxu0 %v1775_v18 }
 0xa9e   :  { %2151 = vmatpush3.msra.mxu0 %v1775_v18 }
 0xa9f   :  { %2152 = vmatprep.subr.mxu0 %v1774_v6 }
 0xaa0   :  { %2153 = vmatpush3.msra.mxu0 %v1774_v6 }
 0xaa1   :  { %2154 = vmatprep.subr.mxu0 %v1773_v33 }
 0xaa2   :  { %2155 = vmatpush3.msra.mxu0 %v1773_v33 }
 0xaa3   :  { %2156 = vmatprep.subr.mxu0 %v1772_v34 }
 0xaa4   :  { %2157 = vmatpush3.msra.mxu0 %v1772_v34 }
 0xaa5   :  { %2158 = vmatprep.subr.mxu0 %v1771_v11 }
 0xaa6   :  { %2159 = vmatpush3.msra.mxu0 %v1771_v11 }
 0xaa7   :  { %2160 = vmatprep.subr.mxu0 %v1770_v35 }
 0xaa8   :  { %2161 = vmatpush3.msra.mxu0 %v1770_v35 }
 0xb59   :  { %v2134_v47 = vpop.f32.mrf.mxu0 }
 0xb5a   :  { %v1626_v56 = vadd.f32 %v2134_v47, %v1960_v55 }
 0xb5b   :  { %v1620_v57 = vpop.f32.mrf.mxu0 }
 0xb5c   :  { %v1621_v58 = vadd.f32 %v1960_v55, %v1620_v57  ;;  %v1630_v59 = vadd.f32 %v1626_v56, %v2411_v5 }
 0xb5e   :  { %v1634_v60 = vsel %vm87_vm0, %v1630_v59, 0.0  ;;  %v1629_v61 = vadd.f32 %v1621_v58, %v2401_v2  ;;  %v1679_v2 = vld [vmem:[%s2659_s8 + $0x18] sm:$0xff] }
 0xb5f   :  { %1635 = vadd.xlane.f32.xlu1 %v1634_v60  ;;  %2135 = vmatprep.subr.mxu1 %v1679_v2 }
 0xb60   :  { %v1631_v49 = vsel %vm87_vm0, %v1629_v61, 0.0  ;;  %2136 = vmatpush3.msra.mxu1 %v1679_v2  ;;  %v1972_v2 = vld [vmem:[%s2664_s13] ss:$0 sm:$0xff] }
 0xb61   :  { %1632 = vadd.xlane.f32.xlu0 %v1631_v49  ;;  %2137 = vmatprep.subr.mxu1 %v1678_v12 }
 0xb62   :  { %2138 = vmatpush3.msra.mxu1 %v1678_v12 }
 0xb63   :  { %2139 = vmatprep.subr.mxu1 %v1677_v13 }
 0xb64   :  { %2140 = vmatpush3.msra.mxu1 %v1677_v13 }
 0xb65   :  { %2141 = vmatprep.subr.mxu1 %v1676_v14 }
 0xb66   :  { %2142 = vmatpush3.msra.mxu1 %v1676_v14 }
 0xbe8   :  { %v1636_v62 = vpop.xlane.xlu1 %1635 }
 0xbe9   :  { %v1639_v63 = vmul.f32 0.03125, %v1636_v62 }
 0xbea   :  { %v1633_v0 = vpop.xlane.xlu0 %1632 }
 0xbeb   :  { %v1638_v1 = vmul.f32 0.03125, %v1633_v0  ;;  %v1641_v3 = vsub.f32 %v1630_v59, %v1639_v63 }
 0xbed   :  { %v1640_v4 = vsub.f32 %v1629_v61, %v1638_v1  ;;  %v1643_v9 = vmul.f32 %v1641_v3, %v1641_v3 }
 0xbef   :  { %v1642_v7 = vmul.f32 %v1640_v4, %v1640_v4  ;;  %v1647_v5 = vsel %vm87_vm0, %v1643_v9, 0.0 }
 0xbf1   :  { %v1644_v8 = vsel %vm87_vm0, %v1642_v7, 0.0 }
 0xbf2   :  { %1645 = vadd.xlane.f32.xlu0 %v1644_v8  ;;  %v1971_v8 = vld [vmem:[%s2663_s12] ss:$0 sm:$0xff] }
 0xbf6   :  { %1648 = vadd.xlane.f32.xlu0 %v1647_v5 }
 0xc7b   :  { %v1646_v19 = vpop.xlane.xlu0 %1645 }
 0xc7c   :  { %v1650_v20 = vmul.f32 0.03125, %v1646_v19 }
 0xc7e   :  { %v1652_v21 = vadd.f32 1e-05, %v1650_v20 }
 0xc7f   :  { %v1649_v15 = vpop.xlane.xlu0 %1648 }
 0xc80   :  { %2217 = vrsqrt.f32 %v1652_v21  ;;  %v1651_v22 = vmul.f32 0.03125, %v1649_v15 }
 0xc82   :  { %v1653_v23 = vadd.f32 1e-05, %v1651_v22 }
 0xc84   :  { %2219 = vrsqrt.f32 %v1653_v23 }
 0xc8d   :  { %v2218_v24 = vpop.eup %2217 }
 0xc8e   :  { %v1656_v25 = vmul.f32 %v2218_v24, %v1640_v4 }
 0xc90   :  { %v1665_v27 = vmul.f32 %v1963_v10, %v1656_v25 }
 0xc91   :  { %v2220_v28 = vpop.eup %2219 }
 0xc92   :  { %v1657_v29 = vmul.f32 %v2220_v28, %v1641_v3  ;;  %v1674_v30 = vadd.f32 %v1964_v26, %v1665_v27 }
 0xc94   :  { %v1666_v31 = vmul.f32 %v1963_v10, %v1657_v29  ;;  %2143 = vmatprep.mubr.msk.f32.mxu1 %vm87_vm0, %v1674_v30 }
 0xc96   :  { %v1675_v32 = vadd.f32 %v1964_v26, %v1666_v31 }
 0xc98   :  { %2144 = vmatmul.mubr.msk.f32.vlgmr.msra.gmra.mxu1 %vm87_vm0, %v1675_v32 }
 0xd58   :  { %v2145_v37 = vpop.f32.mrf.mxu1 }
 0xd59   :  { %v1765_v38 = vadd.f32 %v2145_v37, %v1965_v36 }
 0xd5a   :  { %v1759_v39 = vpop.f32.mrf.mxu1 }
 0xd5b   :  { %v1760_v40 = vadd.f32 %v1965_v36, %v1759_v39  ;;  %v1769_v42 = vmax.f32 %v1765_v38, 0.0 }
 0xd5d   :  { %v1768_v41 = vmax.f32 %v1760_v40, 0.0 }
 0xd5f   :  { %2162 = vmatprep.mubr.msk.f32.mxu0 %vm1785_vm5, %v1768_v41 }
 0xd60   :  { %2163 = vmatmul.mubr.msk.f32.vlgmr.msra.gmra.mxu0 %vm1785_vm5, %v1769_v42 }
 0xe20   :  { %v2164_v44 = vpop.f32.mrf.mxu0 }
 0xe21   :  { %v1864_v45 = vadd.f32 %v2164_v44, %v1968_v43 }
 0xe22   :  { %v1858_v46 = vpop.f32.mrf.mxu0 }
 0xe23   :  { %v1859_v48 = vadd.f32 %v1968_v43, %v1858_v46  ;;  %v1868_v50 = vadd.f32 %v1864_v45, %v1675_v32 }
 0xe25   :  { %v1872_v51 = vsel %vm87_vm0, %v1868_v50, 0.0  ;;  %v1867_v52 = vadd.f32 %v1859_v48, %v1674_v30 }
 0xe26   :  { %1873 = vadd.xlane.f32.xlu0 %v1872_v51 }
 0xe27   :  { %v1869_v53 = vsel %vm87_vm0, %v1867_v52, 0.0 }
 0xe28   :  { %1870 = vadd.xlane.f32.xlu1 %v1869_v53 }
 0xeaf   :  { %v1874_v54 = vpop.xlane.xlu0 %1873 }
 0xeb0   :  { %v1876_v55 = vmul.f32 0.03125, %v1874_v54 }
 0xeb1   :  { %v1871_v47 = vpop.xlane.xlu1 %1870 }
 0xeb2   :  { %v1878_v56 = vsub.f32 %v1868_v50, %v1876_v55  ;;  %v1875_v57 = vmul.f32 0.03125, %v1871_v47 }
 0xeb4   :  { %v1877_v58 = vsub.f32 %v1867_v52, %v1875_v57  ;;  %v1880_v59 = vmul.f32 %v1878_v56, %v1878_v56 }
 0xeb6   :  { %v1884_v60 = vsel %vm87_vm0, %v1880_v59, 0.0  ;;  %v1879_v61 = vmul.f32 %v1877_v58, %v1877_v58 }
 0xeb7   :  { %1885 = vadd.xlane.f32.xlu0 %v1884_v60 }
 0xeb8   :  { %v1881_v49 = vsel %vm87_vm0, %v1879_v61, 0.0 }
 0xeb9   :  { %1882 = vadd.xlane.f32.xlu1 %v1881_v49 }
 0xf40   :  { %v1886_v62 = vpop.xlane.xlu0 %1885 }
 0xf41   :  { %v1888_v63 = vmul.f32 0.03125, %v1886_v62 }
 0xf42   :  { %v1883_v0 = vpop.xlane.xlu1 %1882 }
 0xf43   :  { %v1890_v1 = vadd.f32 1e-05, %v1888_v63  ;;  %v1887_v3 = vmul.f32 0.03125, %v1883_v0 }
 0xf45   :  { %2221 = vrsqrt.f32 %v1890_v1  ;;  %v1889_v4 = vadd.f32 1e-05, %v1887_v3 }
 0xf47   :  { %2223 = vrsqrt.f32 %v1889_v4 }
 0xf52   :  { %v2222_v7 = vpop.eup %2221 }
 0xf53   :  { %v1894_v9 = vmul.f32 %v2222_v7, %v1878_v56 }
 0xf54   :  { %v2224_v5 = vpop.eup %2223 }
 0xf55   :  { %v1893_v12 = vmul.f32 %v2224_v5, %v1877_v58  ;;  %v1903_v13 = vmul.f32 %v1971_v8, %v1894_v9 }
 0xf57   :  { %v1902_v14 = vmul.f32 %v1971_v8, %v1893_v12  ;;  %v1912_v16 = vadd.f32 %v1972_v2, %v1903_v13 }
 0xf59   :  { %v1911_v17 = vadd.f32 %v1972_v2, %v1902_v14  ;;  %1914 = vst.msk [vmem:[#allocation7 + $0x8] sm:$0xff] %vm87_vm0, %v1912_v16 }
 0xf5b   :  { %1913 = vst.msk [vmem:[#allocation7] sm:$0xff] %vm87_vm0, %v1911_v17 }
 0xf5c   :  { %2276 = shalt.err (!%p2273_p0)
}
 0xf5d   :  { %1926 = dma.vmem_to_hbm [thread:$0]  %s1921_s1, 256, %s2665_s14, [#allocation4], %s2292_s16, %s2292_s16, %s2293_s17  }
 0xf5e   :  { %2289 = dma.done.wait [#allocation4], 256  }
 0xf5f   :  { %2290 = vsyncadd [#allocation4], 4294967040 }
 0xf60   :  { %1930 = vsyncpa [#allocation3], 1 }
 0xf61   :  { %1931 = vsyncpa [#allocation6], 1 }
 0xf62   :  { %1932 = vsyncpa [#allocation4], 1 }

</bundles_post_ra>
